<compile_context>
chip_gen: v7x
topology: tpu7x:2x2x1
jax: 0.10.0
libtpu: 0.0.40
codegen_flags: <defaults>
</compile_context>

<pallas_src>
import functools

import jax
import jax.numpy as jnp
from jax import lax
from jax.experimental import pallas as pl
from jax.experimental.pallas import tpu as pltpu

# Module hyper-parameters (stand in for the MAX_SEQ_LEN / NUM_HEADS env vars).
MAX_SEQ_LEN = 8
NUM_HEADS = 2
NUM_FEATURES = 32
VOCAB_SIZE = 64          # vocab of the loaded `emb` table (synthetic)
DEP_VOCAB = 36 + 1       # nn.Embedding(36 + 1, F, padding_idx=36)
PAD_ID = 36
F_PAD = 128              # lane-dense feature padding of the combined table
V_PAD = 128              # combined rows (64 + 37 = 101) padded to one MXU K tile


# ----------------------------------------------------------------------------
# Pallas kernel: fused (token + dependency) embedding lookup, one-hot matmuls.
# ----------------------------------------------------------------------------
def _fused_embed_kernel(tok_ids_ref, dep_ids_ref, table_ref,
                        out_tok_ref, out_dep_ref, *, v_emb):
    # tok_ids_ref : (1, n_tok) int32, lane-dense token ids in [0, v_emb).
    # dep_ids_ref : (1, n_dep) int32, raw dependency labels in {-1, 0..35}.
    # table_ref   : (V_PAD, F_PAD) f32.  Rows [0, v_emb) = token table, rows
    #               [v_emb, v_emb + 37) = dep table; row v_emb + PAD_ID and all
    #               padding rows are zero.
    # out_tok_ref : (n_tok, F_PAD) f32, lane-dense.
    # out_dep_ref : (n_dep, F_PAD) f32, lane-dense.
    #
    # Contract (vs torch.nn.Embedding, which would raise): out-of-range ids
    # silently select a zero padding row (or, for token ids >= v_emb, alias a
    # dependency row).
    v = table_ref.shape[0]
    n_tok = out_tok_ref.shape[0]
    n_dep = out_dep_ref.shape[0]
    table = table_ref[...]
    dn = (((0,), (0,)), ((), ()))   # contract dim 0 of both operands (no .T)

    # --- token embeddings: x = self.emb(in_ids) ------------------------------
    tok = tok_ids_ref[...]                                        # (1, n_tok)
    iota_tok = lax.broadcasted_iota(jnp.int32, (v, n_tok), 0)     # (V, n_tok)
    onehot_tok = (iota_tok == tok).astype(jnp.float32)            # sublane bcast
    out_tok_ref[...] = lax.dot_general(
        onehot_tok, table, dimension_numbers=dn,
        preferred_element_type=jnp.float32).astype(out_tok_ref.dtype)

    # --- dependency embeddings: self.dep_emb(mask) ---------------------------
    # DepedencyEmbedding: dep_mask[dep_mask == -1] = 36, then offset into the
    # combined table.  Row (v_emb + PAD_ID) is zero, so `embeddings[...] = 0`
    # falls out of the matmul for free.
    dep = dep_ids_ref[...]                                        # (1, n_dep)
    dep = jnp.where(dep == -1, PAD_ID, dep) + v_emb
    iota_dep = lax.broadcasted_iota(jnp.int32, (v, n_dep), 0)     # (V, n_dep)
    onehot_dep = (iota_dep == dep).astype(jnp.float32)
    out_dep_ref[...] = lax.dot_general(
        onehot_dep, table, dimension_numbers=dn,
        preferred_element_type=jnp.float32).astype(out_dep_ref.dtype)


# ----------------------------------------------------------------------------
# Host-side parameter prep (done once, like module __init__).
# ----------------------------------------------------------------------------
def prepare_combined_table(emb_table, dep_table):
    """Stack token + dependency tables into one lane-dense (V_PAD, F_PAD) table.

    Invariant: row (v_emb + PAD_ID) and every padding row are zero, so the
    kernel's one-hot matmul reproduces `embeddings[dep_mask == 36] = 0` with no
    extra select.
    """
    v_emb, f = emb_table.shape
    dep = dep_table.at[PAD_ID].set(0.0)
    comb = jnp.concatenate([emb_table, dep.astype(emb_table.dtype)], axis=0)
    v = comb.shape[0]
    assert v <= V_PAD and f <= F_PAD, (v, f)
    table = jnp.zeros((V_PAD, F_PAD), comb.dtype).at[:v, :f].set(comb)
    return table, v_emb


def _vmem_spec():
    return pl.BlockSpec(memory_space=pltpu.MemorySpace.VMEM)


# ----------------------------------------------------------------------------
# DependencyEncoder.forward
# ----------------------------------------------------------------------------
@functools.partial(jax.jit, static_argnames=("v_emb",))
def dependency_encoder_forward(in_ids, mask, combined_table, v_emb):
    """in_ids: (B, S) int32, mask: (B, S, S) int32 with values in {-1, 0..35}."""
    assert in_ids.shape[-1] == mask.shape[-2] == MAX_SEQ_LEN, (
        f"size mismatch \ninput_ids : {in_ids.shape} \nmask : {mask.shape}")
    b, s = in_ids.shape
    s2 = mask.shape[-1]
    f = NUM_FEATURES
    v_pad, f_pad = combined_table.shape

    n_tok = b * s
    n_dep = b * s * s2

    # Contiguous reshapes only (metadata bitcasts) -- no concatenate, no pad,
    # no extra HBM materialization of an id slab.
    tok_ids = in_ids.reshape(1, n_tok).astype(jnp.int32)
    dep_ids = mask.reshape(1, n_dep).astype(jnp.int32)

    kernel = functools.partial(_fused_embed_kernel, v_emb=v_emb)
    cost = pl.CostEstimate(
        flops=2 * (n_tok + n_dep) * v_pad * f_pad,
        transcendentals=0,
        bytes_accessed=(n_tok + n_dep) * 4 + combined_table.size * 4
        + (n_tok + n_dep) * f_pad * 4,
    )

    out_tok, out_dep = pl.pallas_call(
        kernel,
        out_shape=(
            jax.ShapeDtypeStruct((n_tok, f_pad), combined_table.dtype),
            jax.ShapeDtypeStruct((n_dep, f_pad), combined_table.dtype),
        ),
        in_specs=[_vmem_spec(), _vmem_spec(), _vmem_spec()],
        out_specs=(_vmem_spec(), _vmem_spec()),
        cost_estimate=cost,
    )(tok_ids, dep_ids, combined_table)

    # Only the lane slice [:, :F] remains host-side; row splitting happened
    # in-kernel, and the reshapes below are contiguous (free).
    x = out_tok[:, :f].reshape(b, s, f)
    mask_vec = out_dep[:, :f].reshape(b, s, s2, f)
    # TODO(synk): the PyTorch forward ends with `pass` (returns None) and never
    # applies self.rotary_emb; we return the computed intermediates instead.
    return x, mask_vec


# ----------------------------------------------------------------------------
# Pure-JAX reference for correctness checking.
# ----------------------------------------------------------------------------
def _ref_forward(in_ids, mask, emb_table, dep_table):
    x = emb_table[in_ids]
    m = jnp.where(mask == -1, PAD_ID, mask)
    mv = dep_table[m]
    mv = jnp.where((m == PAD_ID)[..., None], 0.0, mv)
    return x, mv


if __name__ == "__main__":
    key = jax.random.PRNGKey(0)
    k_emb, k_dep, k_ids, k_mask, k_pad = jax.random.split(key, 5)

    # Deterministic parameter init (stands in for utils/embed.pt + dep_emb).
    emb_table = jax.random.normal(k_emb, (VOCAB_SIZE, NUM_FEATURES), jnp.float32)
    dep_table = jax.random.normal(k_dep, (DEP_VOCAB, NUM_FEATURES), jnp.float32)
    dep_table = dep_table.at[PAD_ID].set(0.0)  # padding_idx=36 row is zero

    combined_table, v_emb = prepare_combined_table(emb_table, dep_table)

    # Inputs: batch=2, seq=MAX_SEQ_LEN=8.
    B = 2
    in_ids = jax.random.randint(k_ids, (B, MAX_SEQ_LEN), 0, VOCAB_SIZE,
                                dtype=jnp.int32)
    mask = jax.random.randint(k_mask, (B, MAX_SEQ_LEN, MAX_SEQ_LEN), 0, 36,
                              dtype=jnp.int32)
    # Sprinkle in some -1 (unlabeled / padding dependencies).
    pad_positions = jax.random.bernoulli(k_pad, 0.3, mask.shape)
    mask = jnp.where(pad_positions, -1, mask)

    x, mask_vec = dependency_encoder_forward(in_ids, mask, combined_table, v_emb)
    jax.block_until_ready((x, mask_vec))

    x_ref, mv_ref = _ref_forward(in_ids, mask, emb_table, dep_table)
    assert x.shape == (B, MAX_SEQ_LEN, NUM_FEATURES)
    assert mask_vec.shape == (B, MAX_SEQ_LEN, MAX_SEQ_LEN, NUM_FEATURES)
    assert jnp.allclose(x, x_ref, atol=1e-5), "token embedding mismatch"
    assert jnp.allclose(mask_vec, mv_ref, atol=1e-5), "dependency embedding mismatch"

    print("KERNEL_OK")
</pallas_src>

<mosaic_0001>
module attributes {stable_mosaic.version = 11 : i64} {
  func.func @_fused_embed_kernel(%arg0: memref<1x16xi32, #tpu.memory_space<vmem>>, %arg1: memref<1x128xi32, #tpu.memory_space<vmem>>, %arg2: memref<128x128xf32, #tpu.memory_space<vmem>>, %arg3: memref<16x128xf32, #tpu.memory_space<vmem>>, %arg4: memref<128x128xf32, #tpu.memory_space<vmem>>) attributes {dimension_semantics = [], scalar_prefetch = 0 : i64, scratch_operands = 0 : i64, tpu.core_type = #tpu.core_type<tc>} {
    %c0 = arith.constant 0 : index
    %c0_0 = arith.constant 0 : index
    %0 = vector.load %arg2[%c0, %c0_0] : memref<128x128xf32, #tpu.memory_space<vmem>>, vector<128x128xf32>
    %c0_1 = arith.constant 0 : index
    %c0_2 = arith.constant 0 : index
    %1 = vector.load %arg0[%c0_1, %c0_2] : memref<1x16xi32, #tpu.memory_space<vmem>>, vector<1x16xi32>
    %2 = tpu.iota {dimensions = array<i32: 0>} : vector<128x16xi32>
    %3 = vector.broadcast %1 : vector<1x16xi32> to vector<128x16xi32>
    %4 = arith.cmpi eq, %2, %3 : vector<128x16xi32>
    %5 = arith.extui %4 : vector<128x16xi1> to vector<128x16xi32>
    %6 = arith.sitofp %5 : vector<128x16xi32> to vector<128x16xf32>
    %cst = arith.constant dense<0.000000e+00> : vector<16x128xf32>
    %7 = tpu.matmul %6, %0, %cst {dimension_numbers = #tpu.dot_dimension_numbers<[0], [0], [1], [1], [0, 1, 1, 1], [], []>} : vector<128x16xf32>, vector<128x128xf32>, vector<16x128xf32> -> vector<16x128xf32>
    %c0_3 = arith.constant 0 : index
    %c0_4 = arith.constant 0 : index
    %8 = vector.load %arg3[%c0_3, %c0_4] : memref<16x128xf32, #tpu.memory_space<vmem>>, vector<16x128xf32>
    tpu.vector_store %arg3[%c0_3, %c0_4], %7 {strides = array<i32>} : memref<16x128xf32, #tpu.memory_space<vmem>>, vector<16x128xf32>,
    %c0_5 = arith.constant 0 : index
    %c0_6 = arith.constant 0 : index
    %9 = vector.load %arg1[%c0_5, %c0_6] : memref<1x128xi32, #tpu.memory_space<vmem>>, vector<1x128xi32>
    %c-1_i32 = arith.constant -1 : i32
    %10 = vector.broadcast %c-1_i32 : i32 to vector<1x128xi32>
    %11 = arith.cmpi eq, %9, %10 : vector<1x128xi32>
    %c36_i32 = arith.constant 36 : i32
    %12 = vector.broadcast %c36_i32 : i32 to vector<1x128xi32>
    %13 = arith.select %11, %12, %9 : vector<1x128xi1>, vector<1x128xi32>
    %c64_i32 = arith.constant 64 : i32
    %14 = vector.broadcast %c64_i32 : i32 to vector<1x128xi32>
    %15 = arith.addi %13, %14 : vector<1x128xi32>
    %16 = tpu.iota {dimensions = array<i32: 0>} : vector<128x128xi32>
    %17 = vector.broadcast %15 : vector<1x128xi32> to vector<128x128xi32>
    %18 = arith.cmpi eq, %16, %17 : vector<128x128xi32>
    %19 = arith.extui %18 : vector<128x128xi1> to vector<128x128xi32>
    %20 = arith.sitofp %19 : vector<128x128xi32> to vector<128x128xf32>
    %cst_7 = arith.constant dense<0.000000e+00> : vector<128x128xf32>
    %21 = tpu.matmul %20, %0, %cst_7 {dimension_numbers = #tpu.dot_dimension_numbers<[0], [0], [1], [1], [0, 1, 1, 1], [], []>} : vector<128x128xf32>, vector<128x128xf32>, vector<128x128xf32> -> vector<128x128xf32>
    %c0_8 = arith.constant 0 : index
    %c0_9 = arith.constant 0 : index
    %22 = vector.load %arg4[%c0_8, %c0_9] : memref<128x128xf32, #tpu.memory_space<vmem>>, vector<128x128xf32>
    tpu.vector_store %arg4[%c0_8, %c0_9], %21 {strides = array<i32>} : memref<128x128xf32, #tpu.memory_space<vmem>>, vector<128x128xf32>,
    return
  }
}

</mosaic_0001>

<bundles_post_ra>
// kernel: dependency_encoder_forward.1
= control target key start
LH: loop header
LB: loop body
LE: loop exit
PB: predicated region body
PF: predicated region fallthrough
CT: control target
= control target key end

     0   :  { %10 = vsyncpa [#allocation3], 0  ;;  %s947_s0 = inlined_call_operand.vmem [shape: s32[1,16], index: 0, kind: input, shape index: {}]   ;;  %s948_s1 = inlined_call_operand.vmem [shape: s32[1,128], index: 1, kind: input, shape index: {}]   ;;  %s949_s2 = inlined_call_operand.hbm [shape: f32[128,128], index: 2, kind: input, shape index: {}]   ;;  %s950_s3 = inlined_call_operand.vmem [shape: f32[16,128], index: 3, kind: output, shape index: {0}]   ;;  %s951_s4 = inlined_call_operand.hbm [shape: f32[128,128], index: 4, kind: output, shape index: {1}]  }
   0x1   :  { %11 = vsyncpa [#allocation4], 0  ;;  %s787_s15 = smov [#allocation2]   ;;  %s739_s19 = scalar_lea.hbm %s949_s2, 2048 }
   0x2   :  { %s21_s16 = sshll.u32 %s787_s15, 4  ;;  %p740_p0 = scmp.ne.s32.totalorder %s949_s2, %s739_s19  ;;  %s22_s16 = int_to_ptr.vmem [resolvable:$true] %s21_s16 }
   0x3   :  { %p743_p1 = scmp.lt.u32.totalorder %s739_s19, %s949_s2 }
   0x5   :  { %p745_p2 = pnand %p743_p1, %p740_p0 }
   0x7   :  { %748 = shalt.err (!%p745_p2)
}
   0x8   :  { %s749_s24 = scalar_lea.vmem %s22_s16, 2048  ;;  %p754_p4 = scmp.lt.s32.totalorder %s22_s16, %s22_s16 }
   0x9   :  { %p750_p3 = scmp.ne.s32.totalorder %s22_s16, %s749_s24  ;;  %p755_p5 = scmp.lt.s32.totalorder %s749_s24, %s749_s24 }
   0xb   :  { %p756_p6 = por %p755_p5, %p754_p4 }
   0xd   :  { %p757_p7 = pnand %p756_p6, %p750_p3 }
   0xf   :  { %760 = shalt.err (!%p757_p7)
}
  0x10   :  { %s788_s25 = smov 128   ;;  %s789_s26 = smov 8  }
  0x11   :  { %27 = dma.hbm_to_vmem [thread:$0]  %s949_s2, 2048, %s22_s16, [#allocation3], %s788_s25, %s788_s25, %s789_s26  }
  0x12   :  { %783 = dma.done.wait [#allocation3], 2048  }
  0x13   :  { %784 = vsyncadd [#allocation3], 4294965248  ;;  %v48_v0 = vlaneseq  ;;  %v226_v2 = vld [vmem:[%s948_s1] sm:$0x1]  ;;  %v790_v8 = vmov 0.0   ;;  %v32_v20 = vld [vmem:[#allocation2 + $0x8] sm:$0xff] }
  0x14   :  { %vm227_vm0 = vcmp.eq.s32.totalorder %v226_v2, 4294967295  ;;  %v842_v5 = vld [vmem:[%s947_s0] ss:$0 sm:$0xff]  ;;  %v33_v22 = vld [vmem:[#allocation2 + $0x10] sm:$0xff]  ;;  %v34_v23 = vld [vmem:[#allocation2 + $0x18] sm:$0xff] }
  0x15   :  { %v832_v1 = vshrl.u32 %v48_v0, 7  ;;  %v228_v6 = vsel %vm227_vm0, 36, %v226_v2  ;;  %v31_v19 = vld [vmem:[#allocation2] sm:$0xff]  ;;  %v674_v27 = vpack.c.bf16 %v34_v23, %v33_v22  ;;  %v36_v29 = vld [vmem:[#allocation2 + $0x28] sm:$0xff]  ;;  %v37_v34 = vld [vmem:[#allocation2 + $0x30] sm:$0xff] }
  0x16   :  { %v229_v7 = vadd.s32 64, %v228_v6  ;;  %v670_v25 = vpack.c.bf16 %v32_v20, %v31_v19  ;;  %v35_v28 = vld [vmem:[#allocation2 + $0x20] sm:$0xff]  ;;  %v38_v35 = vld [vmem:[#allocation2 + $0x38] sm:$0xff]  ;;  %v40_v41 = vld [vmem:[#allocation2 + $0x48] sm:$0xff] }
  0x17   :  { %v50_v3 = vadd.s32 8, %v832_v1  ;;  %v232_v4 = vsub.s32 0, %v832_v1  ;;  %vm69_vm1 = vcmp.eq.s32.totalorder %v832_v1, %v842_v5  ;;  %v51_v10 = vadd.s32 16, %v832_v1  ;;  %v39_v40 = vld [vmem:[#allocation2 + $0x40] sm:$0xff]  ;;  %v41_v46 = vld [vmem:[#allocation2 + $0x50] sm:$0xff]  ;;  %v42_v47 = vld [vmem:[#allocation2 + $0x58] sm:$0xff] }
  0x18   :  { %v497_v9 = vsel %vm69_vm1, 1.0, %v790_v8  ;;  %v52_v14 = vadd.s32 24, %v832_v1  ;;  %v53_v17 = vadd.s32 32, %v832_v1  ;;  %v54_v24 = vadd.s32 40, %v832_v1  ;;  %703 = vmatprep.subr.bf16.mxu1 %v670_v25  ;;  %671 = vmatprep.subr.bf16.mxu0 %v670_v25  ;;  %v43_v52 = vld [vmem:[#allocation2 + $0x60] sm:$0xff]  ;;  %v44_v53 = vld [vmem:[#allocation2 + $0x68] sm:$0xff] }
  0x19   :  { %vm70_vm2 = vcmp.eq.s32.totalorder %v50_v3, %v842_v5  ;;  %117 = vxpose.xlu1.b32.start [1/16] (narrow) %v497_v9, 16  ;;  %v849_v11 = vrot.slane %v229_v7, %v232_v4  ;;  %vm71_vm3 = vcmp.eq.s32.totalorder %v51_v10, %v842_v5  ;;  %705 = vmatpush3.bf16.msra.mxu1 %v670_v25  ;;  %v55_v31 = vadd.s32 48, %v832_v1  ;;  %v45_v58 = vld [vmem:[#allocation2 + $0x70] sm:$0xff]  ;;  %v46_v59 = vld [vmem:[#allocation2 + $0x78] sm:$0xff] }
  0x1a   :  { %v498_v12 = vsel %vm70_vm2, 1.0, %v790_v8  ;;  %v499_v15 = vsel %vm71_vm3, 1.0, %v790_v8  ;;  %vm72_vm6 = vcmp.eq.s32.totalorder %v52_v14, %v842_v5  ;;  %vm73_vm8 = vcmp.eq.s32.totalorder %v53_v17, %v842_v5  ;;  %673 = vmatpush3.bf16.msra.mxu0 %v670_v25  ;;  %707 = vmatprep.subr.bf16.mxu1 %v674_v27 }
  0x1b   :  { %vm234_vm4 = vcmp.eq.s32.totalorder %v832_v1, %v849_v11  ;;  %vm235_vm5 = vcmp.eq.s32.totalorder %v50_v3, %v849_v11  ;;  %vm236_vm7 = vcmp.eq.s32.totalorder %v51_v10, %v849_v11  ;;  %v500_v18 = vsel %vm72_vm6, 1.0, %v790_v8  ;;  %675 = vmatprep.subr.bf16.mxu0 %v674_v27 }
  0x1c   :  { %v513_v13 = vsel %vm234_vm4, 1.0, %v790_v8  ;;  %v514_v16 = vsel %vm235_vm5, 1.0, %v790_v8  ;;  %v515_v21 = vsel %vm236_vm7, 1.0, %v790_v8  ;;  %vm237_vm9 = vcmp.eq.s32.totalorder %v52_v14, %v849_v11 }
  0x1d   :  { %118 = vxpose.xlu1.b32.cont [2/16] (narrow) %v498_v12, 16  ;;  %282 = vxpose.xlu0.b32.start [1/16] %v513_v13, 128  ;;  %v501_v26 = vsel %vm73_vm8, 1.0, %v790_v8  ;;  %v516_v30 = vsel %vm237_vm9, 1.0, %v790_v8  ;;  %vm74_vm10 = vcmp.eq.s32.totalorder %v54_v24, %v842_v5  ;;  %vm238_vm11 = vcmp.eq.s32.totalorder %v53_v17, %v849_v11 }
  0x1e   :  { %v678_v32 = vpack.c.bf16 %v36_v29, %v35_v28  ;;  %v502_v33 = vsel %vm74_vm10, 1.0, %v790_v8  ;;  %v517_v36 = vsel %vm238_vm11, 1.0, %v790_v8  ;;  %vm75_vm12 = vcmp.eq.s32.totalorder %v55_v31, %v842_v5  ;;  %709 = vmatpush3.bf16.msra.mxu1 %v674_v27  ;;  %677 = vmatpush3.bf16.msra.mxu0 %v674_v27 }
  0x1f   :  { %vm239_vm13 = vcmp.eq.s32.totalorder %v54_v24, %v849_v11  ;;  %v56_v37 = vadd.s32 56, %v832_v1  ;;  %v682_v38 = vpack.c.bf16 %v38_v35, %v37_v34  ;;  %v503_v39 = vsel %vm75_vm12, 1.0, %v790_v8 }
  0x20   :  { %711 = vmatprep.subr.bf16.mxu1 %v678_v32  ;;  %679 = vmatprep.subr.bf16.mxu0 %v678_v32  ;;  %v518_v42 = vsel %vm239_vm13, 1.0, %v790_v8  ;;  %vm240_vm15 = vcmp.eq.s32.totalorder %v55_v31, %v849_v11  ;;  %v57_v43 = vadd.s32 64, %v832_v1  ;;  %v686_v44 = vpack.c.bf16 %v40_v41, %v39_v40 }
  0x21   :  { %119 = vxpose.xlu1.b32.cont [3/16] (narrow) %v499_v15, 16  ;;  %283 = vxpose.xlu0.b32.cont [2/16] %v514_v16, 128  ;;  %vm76_vm14 = vcmp.eq.s32.totalorder %v56_v37, %v842_v5  ;;  %v519_v48 = vsel %vm240_vm15, 1.0, %v790_v8  ;;  %vm241_vm1 = vcmp.eq.s32.totalorder %v56_v37, %v849_v11  ;;  %v58_v49 = vadd.s32 72, %v832_v1 }
  0x22   :  { %713 = vmatpush3.bf16.msra.mxu1 %v678_v32  ;;  %681 = vmatpush3.bf16.msra.mxu0 %v678_v32  ;;  %v504_v45 = vsel %vm76_vm14, 1.0, %v790_v8  ;;  %vm77_vm0 = vcmp.eq.s32.totalorder %v57_v43, %v842_v5  ;;  %v690_v50 = vpack.c.bf16 %v42_v47, %v41_v46  ;;  %v520_v54 = vsel %vm241_vm1, 1.0, %v790_v8 }
  0x23   :  { %715 = vmatprep.subr.bf16.mxu1 %v682_v38  ;;  %683 = vmatprep.subr.bf16.mxu0 %v682_v38  ;;  %v505_v51 = vsel %vm77_vm0, 1.0, %v790_v8  ;;  %vm78_vm2 = vcmp.eq.s32.totalorder %v58_v49, %v842_v5  ;;  %vm242_vm3 = vcmp.eq.s32.totalorder %v57_v43, %v849_v11  ;;  %v59_v55 = vadd.s32 80, %v832_v1 }
  0x24   :  { %v694_v56 = vpack.c.bf16 %v44_v53, %v43_v52  ;;  %v506_v57 = vsel %vm78_vm2, 1.0, %v790_v8  ;;  %v521_v60 = vsel %vm242_vm3, 1.0, %v790_v8  ;;  %vm243_vm5 = vcmp.eq.s32.totalorder %v58_v49, %v849_v11 }
  0x25   :  { %120 = vxpose.xlu1.b32.cont [4/16] (narrow) %v500_v18, 16  ;;  %284 = vxpose.xlu0.b32.cont [3/16] %v515_v21, 128  ;;  %vm79_vm4 = vcmp.eq.s32.totalorder %v59_v55, %v842_v5  ;;  %v60_v61 = vadd.s32 88, %v832_v1  ;;  %v698_v62 = vpack.c.bf16 %v46_v59, %v45_v58  ;;  %v522_v0 = vsel %vm243_vm5, 1.0, %v790_v8 }
  0x26   :  { %717 = vmatpush3.bf16.msra.mxu1 %v682_v38  ;;  %685 = vmatpush3.bf16.msra.mxu0 %v682_v38  ;;  %v507_v63 = vsel %vm79_vm4, 1.0, %v790_v8  ;;  %vm244_vm7 = vcmp.eq.s32.totalorder %v59_v55, %v849_v11  ;;  %v61_v2 = vadd.s32 96, %v832_v1  ;;  %v62_v6 = vadd.s32 104, %v832_v1 }
  0x27   :  { %719 = vmatprep.subr.bf16.mxu1 %v686_v44  ;;  %687 = vmatprep.subr.bf16.mxu0 %v686_v44  ;;  %vm80_vm6 = vcmp.eq.s32.totalorder %v60_v61, %v842_v5  ;;  %v523_v4 = vsel %vm244_vm7, 1.0, %v790_v8  ;;  %vm245_vm9 = vcmp.eq.s32.totalorder %v60_v61, %v849_v11  ;;  %v63_v10 = vadd.s32 112, %v832_v1 }
  0x28   :  { %v508_v3 = vsel %vm80_vm6, 1.0, %v790_v8  ;;  %vm81_vm8 = vcmp.eq.s32.totalorder %v61_v2, %v842_v5  ;;  %v524_v9 = vsel %vm245_vm9, 1.0, %v790_v8  ;;  %vm82_vm10 = vcmp.eq.s32.totalorder %v62_v6, %v842_v5 }
  0x29   :  { %121 = vxpose.xlu1.b32.cont [5/16] (narrow) %v501_v26, 16  ;;  %285 = vxpose.xlu0.b32.cont [4/16] %v516_v30, 128  ;;  %v509_v7 = vsel %vm81_vm8, 1.0, %v790_v8  ;;  %vm246_vm11 = vcmp.eq.s32.totalorder %v61_v2, %v849_v11  ;;  %v510_v12 = vsel %vm82_vm10, 1.0, %v790_v8  ;;  %vm83_vm12 = vcmp.eq.s32.totalorder %v63_v10, %v842_v5 }
  0x2a   :  { %721 = vmatpush3.bf16.msra.mxu1 %v686_v44  ;;  %689 = vmatpush3.bf16.msra.mxu0 %v686_v44  ;;  %v525_v13 = vsel %vm246_vm11, 1.0, %v790_v8  ;;  %vm247_vm13 = vcmp.eq.s32.totalorder %v62_v6, %v849_v11  ;;  %v64_v14 = vadd.s32 120, %v832_v1  ;;  %v511_v15 = vsel %vm83_vm12, 1.0, %v790_v8 }
  0x2b   :  { %723 = vmatprep.subr.bf16.mxu1 %v690_v50  ;;  %691 = vmatprep.subr.bf16.mxu0 %v690_v50  ;;  %v526_v16 = vsel %vm247_vm13, 1.0, %v790_v8  ;;  %vm248_vm15 = vcmp.eq.s32.totalorder %v63_v10, %v849_v11 }
  0x2c   :  { %vm84_vm14 = vcmp.eq.s32.totalorder %v64_v14, %v842_v5  ;;  %v527_v18 = vsel %vm248_vm15, 1.0, %v790_v8  ;;  %vm249_vm0 = vcmp.eq.s32.totalorder %v64_v14, %v849_v11 }
  0x2d   :  { %122 = vxpose.xlu1.b32.cont [6/16] (narrow) %v502_v33, 16  ;;  %286 = vxpose.xlu0.b32.cont [5/16] %v517_v36, 128  ;;  %v512_v17 = vsel %vm84_vm14, 1.0, %v790_v8  ;;  %v528_v1 = vsel %vm249_vm0, 1.0, %v790_v8 }
  0x2e   :  { %725 = vmatpush3.bf16.msra.mxu1 %v690_v50  ;;  %693 = vmatpush3.bf16.msra.mxu0 %v690_v50 }
  0x2f   :  { %727 = vmatprep.subr.bf16.mxu1 %v694_v56  ;;  %695 = vmatprep.subr.bf16.mxu0 %v694_v56 }
  0x31   :  { %123 = vxpose.xlu1.b32.cont [7/16] (narrow) %v503_v39, 16  ;;  %287 = vxpose.xlu0.b32.cont [6/16] %v518_v42, 128 }
  0x32   :  { %729 = vmatpush3.bf16.msra.mxu1 %v694_v56  ;;  %697 = vmatpush3.bf16.msra.mxu0 %v694_v56 }
  0x33   :  { %731 = vmatprep.subr.bf16.mxu1 %v698_v62  ;;  %699 = vmatprep.subr.bf16.mxu0 %v698_v62 }
  0x35   :  { %124 = vxpose.xlu1.b32.cont [8/16] (narrow) %v504_v45, 16  ;;  %288 = vxpose.xlu0.b32.cont [7/16] %v519_v48, 128 }
  0x36   :  { %733 = vmatpush3.bf16.msra.mxu1 %v698_v62  ;;  %701 = vmatpush3.bf16.msra.mxu0 %v698_v62 }
  0x39   :  { %125 = vxpose.xlu1.b32.cont [9/16] (narrow) %v505_v51, 16  ;;  %289 = vxpose.xlu0.b32.cont [8/16] %v520_v54, 128 }
  0x3d   :  { %126 = vxpose.xlu1.b32.cont [10/16] (narrow) %v506_v57, 16  ;;  %290 = vxpose.xlu0.b32.cont [9/16] %v521_v60, 128 }
  0x41   :  { %127 = vxpose.xlu1.b32.cont [11/16] (narrow) %v507_v63, 16  ;;  %291 = vxpose.xlu0.b32.cont [10/16] %v522_v0, 128 }
  0x45   :  { %128 = vxpose.xlu1.b32.cont [12/16] (narrow) %v508_v3, 16  ;;  %292 = vxpose.xlu0.b32.cont [11/16] %v523_v4, 128 }
  0x49   :  { %129 = vxpose.xlu1.b32.cont [13/16] (narrow) %v509_v7, 16  ;;  %293 = vxpose.xlu0.b32.cont [12/16] %v524_v9, 128 }
  0x4d   :  { %130 = vxpose.xlu1.b32.cont [14/16] (narrow) %v510_v12, 16  ;;  %294 = vxpose.xlu0.b32.cont [13/16] %v525_v13, 128 }
  0x51   :  { %131 = vxpose.xlu1.b32.cont [15/16] (narrow) %v511_v15, 16  ;;  %295 = vxpose.xlu0.b32.cont [14/16] %v526_v16, 128 }
  0x55   :  { %132 = vxpose.xlu1.b32.end [16/16] (narrow) %v512_v17, 16  ;;  %296 = vxpose.xlu0.b32.cont [15/16] %v527_v18, 128 }
  0x59   :  { %297 = vxpose.xlu0.b32.end [16/16] %v528_v1, 128 }
  0x99   :  { %v133_v19 = vpop.trf.xlu1 }
  0x9a   :  { %611 = vmatprep.mubr.f32.mxu0 %v133_v19 }
  0x9d   :  { %v134_v20 = vpop.trf.xlu1  ;;  %v298_v21 = vpop.trf.xlu0 }
  0x9e   :  { %612 = vmatmul.mubr.f32.vlgmr.msra.gmra.mrb[0].mxu0 %v134_v20  ;;  %646 = vmatprep.mubr.f32.mxu1 %v298_v21 }
  0xa1   :  { %v299_v5 = vpop.trf.xlu0 }
  0xa2   :  { %647 = vmatmul.mubr.f32.vlgmr.msra.gmra.mrb[0].mxu1 %v299_v5 }
  0xa5   :  { %v300_v22 = vpop.trf.xlu0 }
  0xa6   :  { %649 = vmatprep.mubr.f32.mxu1 %v300_v22 }
  0xa9   :  { %v301_v23 = vpop.trf.xlu0 }
  0xaa   :  { %650 = vmatmul.mubr.f32.gmra.mrb[2].mxu1 %v301_v23 }
  0xad   :  { %v302_v24 = vpop.trf.xlu0 }
  0xae   :  { %652 = vmatprep.mubr.f32.mxu1 %v302_v24 }
  0xb1   :  { %v303_v11 = vpop.trf.xlu0 }
  0xb2   :  { %653 = vmatmul.mubr.f32.gmra.mrb[4].mxu1 %v303_v11 }
  0xb5   :  { %v304_v25 = vpop.trf.xlu0 }
  0xb6   :  { %655 = vmatprep.mubr.f32.mxu1 %v304_v25 }
  0xb9   :  { %v305_v8 = vpop.trf.xlu0 }
  0xba   :  { %656 = vmatmul.mubr.f32.gmra.mrb[6].mxu1 %v305_v8 }
  0xbd   :  { %v306_v26 = vpop.trf.xlu0 }
  0xbe   :  { %658 = vmatprep.mubr.f32.mxu1 %v306_v26 }
  0xc1   :  { %v307_v27 = vpop.trf.xlu0 }
  0xc2   :  { %659 = vmatmul.mubr.f32.gmra.mrb[8].mxu1 %v307_v27 }
  0xc5   :  { %v308_v28 = vpop.trf.xlu0 }
  0xc6   :  { %661 = vmatprep.mubr.f32.mxu1 %v308_v28 }
  0xc9   :  { %v309_v29 = vpop.trf.xlu0 }
  0xca   :  { %662 = vmatmul.mubr.f32.gmra.mrb[10].mxu1 %v309_v29 }
  0xcd   :  { %v310_v30 = vpop.trf.xlu0 }
  0xce   :  { %664 = vmatprep.mubr.f32.mxu1 %v310_v30 }
  0xd1   :  { %v311_v31 = vpop.trf.xlu0 }
  0xd2   :  { %665 = vmatmul.mubr.f32.gmra.mrb[12].mxu1 %v311_v31 }
  0xd5   :  { %v312_v32 = vpop.trf.xlu0 }
  0xd6   :  { %667 = vmatprep.mubr.f32.mxu1 %v312_v32 }
  0xd9   :  { %v313_v33 = vpop.trf.xlu0 }
  0xda   :  { %668 = vmatmul.mubr.f32.gmra.mrb[14].mxu1 %v313_v33 }
 0x171   :  { %v613_v34 = vpop.f32.mrb[0].mxu0 }
 0x172   :  { %225 = vst [vmem:[%s950_s3 + $0x8] sm:$0xff] %v613_v34  ;;  %v215_v35 = vpop.f32.mrb[1].mxu0 }
 0x173   :  { %224 = vst [vmem:[%s950_s3] sm:$0xff] %v215_v35  ;;  %s791_s3 = smov [#allocation5]  }
 0x174   :  { %s482_s8 = sshll.u32 %s791_s3, 4  ;;  %s483_s8 = int_to_ptr.vmem [resolvable:$true] %s482_s8 }
 0x175   :  { %v648_v36 = vpop.f32.mrb[0].mxu1  ;;  %s761_s9 = scalar_lea.vmem %s483_s8, 2048  ;;  %p766_p9 = scmp.lt.s32.totalorder %s483_s8, %s483_s8 }
 0x176   :  { %460 = vst [vmem:[#allocation5 + $0x8] sm:$0xff] %v648_v36  ;;  %v380_v37 = vpop.f32.mrb[1].mxu1  ;;  %p762_p8 = scmp.ne.s32.totalorder %s483_s8, %s761_s9  ;;  %p767_p10 = scmp.lt.s32.totalorder %s761_s9, %s761_s9 }
 0x177   :  { %459 = vst [vmem:[#allocation5] sm:$0xff] %v380_v37 }
 0x178   :  { %p768_p11 = por %p767_p10, %p766_p9 }
 0x17a   :  { %p769_p12 = pnand %p768_p11, %p762_p8 }
 0x17d   :  { %v651_v38 = vpop.f32.mrb[2].mxu1 }
 0x17e   :  { %462 = vst [vmem:[#allocation5 + $0x18] sm:$0xff] %v651_v38  ;;  %v390_v39 = vpop.f32.mrb[3].mxu1 }
 0x17f   :  { %461 = vst [vmem:[#allocation5 + $0x10] sm:$0xff] %v390_v39 }
 0x185   :  { %v654_v40 = vpop.f32.mrb[4].mxu1 }
 0x186   :  { %464 = vst [vmem:[#allocation5 + $0x28] sm:$0xff] %v654_v40  ;;  %v400_v41 = vpop.f32.mrb[5].mxu1 }
 0x187   :  { %463 = vst [vmem:[#allocation5 + $0x20] sm:$0xff] %v400_v41 }
 0x18d   :  { %v657_v42 = vpop.f32.mrb[6].mxu1 }
 0x18e   :  { %466 = vst [vmem:[#allocation5 + $0x38] sm:$0xff] %v657_v42  ;;  %v410_v43 = vpop.f32.mrb[7].mxu1 }
 0x18f   :  { %465 = vst [vmem:[#allocation5 + $0x30] sm:$0xff] %v410_v43 }
 0x195   :  { %v660_v44 = vpop.f32.mrb[8].mxu1 }
 0x196   :  { %468 = vst [vmem:[#allocation5 + $0x48] sm:$0xff] %v660_v44  ;;  %v420_v45 = vpop.f32.mrb[9].mxu1 }
 0x197   :  { %467 = vst [vmem:[#allocation5 + $0x40] sm:$0xff] %v420_v45 }
 0x19d   :  { %v663_v46 = vpop.f32.mrb[10].mxu1 }
 0x19e   :  { %470 = vst [vmem:[#allocation5 + $0x58] sm:$0xff] %v663_v46  ;;  %v430_v47 = vpop.f32.mrb[11].mxu1 }
 0x19f   :  { %469 = vst [vmem:[#allocation5 + $0x50] sm:$0xff] %v430_v47 }
 0x1a5   :  { %v666_v48 = vpop.f32.mrb[12].mxu1 }
 0x1a6   :  { %472 = vst [vmem:[#allocation5 + $0x68] sm:$0xff] %v666_v48  ;;  %v440_v49 = vpop.f32.mrb[13].mxu1 }
 0x1a7   :  { %471 = vst [vmem:[#allocation5 + $0x60] sm:$0xff] %v440_v49 }
 0x1ad   :  { %v669_v50 = vpop.f32.mrb[14].mxu1 }
 0x1ae   :  { %474 = vst [vmem:[#allocation5 + $0x78] sm:$0xff] %v669_v50  ;;  %v450_v51 = vpop.f32.mrb[15].mxu1 }
 0x1af   :  { %473 = vst [vmem:[#allocation5 + $0x70] sm:$0xff] %v450_v51 }
 0x1b0   :  { %772 = shalt.err (!%p769_p12)
}
 0x1b1   :  { %s773_s12 = scalar_lea.hbm %s951_s4, 2048 }
 0x1b2   :  { %p774_p13 = scmp.ne.s32.totalorder %s951_s4, %s773_s12  ;;  %p777_p0 = scmp.lt.u32.totalorder %s773_s12, %s951_s4 }
 0x1b4   :  { %p779_p1 = pnand %p777_p0, %p774_p13 }
 0x1b6   :  { %782 = shalt.err (!%p779_p1)
}
 0x1b7   :  { %488 = dma.vmem_to_hbm [thread:$0]  %s483_s8, 2048, %s951_s4, [#allocation4], %s788_s25, %s788_s25, %s789_s26  }
 0x1b8   :  { %785 = dma.done.wait [#allocation4], 2048  }
 0x1b9   :  { %786 = vsyncadd [#allocation4], 4294965248 }
 0x1ba   :  { %494 = vsyncpa [#allocation3], 1 }
 0x1bb   :  { %495 = vsyncpa [#allocation4], 1 }

</bundles_post_ra>
